<compile_context>
chip_gen: v5e
topology: v5e:2x2
jax: 0.10.0
libtpu: 0.0.40
codegen_flags: <defaults>
</compile_context>

<pallas_src>
import functools

import jax
import jax.numpy as jnp
from jax.experimental import pallas as pl
from jax.experimental.pallas import tpu as pltpu

EPS = 1e-5


def cnnid_kernel(x_ref, w1_ref, b1_ref, g1_ref, bb1_ref,
                 w2_ref, b2_ref, g2_ref, bb2_ref,
                 wf1_ref, bf1_ref, wf2_ref, bf2_ref,
                 out_ref, *, N, L):
    # Static shapes:
    #   x_ref:    (N*L, 1)      raw signal, one column (channel-last row layout)
    #   w1_ref:   (3, C1)       conv1 weight, (k, cout), f32
    #   w2_ref:   (3*C1, C2)    conv2 weight, taps stacked along K (prev|center|next), bf16
    #   wf1_ref:  (C2, 64)      bf16
    #   wf2_ref:  (64, OC)      bf16, OC lane-padded to a multiple of 128
    M = N * L
    C1 = w1_ref.shape[1]
    C2 = b2_ref.shape[1]
    inv_m = 1.0 / M

    # Within-sequence position of every flattened row; used as the +/-1-tap
    # boundary mask (conv padding=1 -> zero taps at sequence edges) and to kill
    # the cross-sequence wrap-around of the full-M roll.
    pos = jax.lax.broadcasted_iota(jnp.int32, (M, 1), 0) % L
    is_first = pos == 0
    is_last = pos == (L - 1)

    # ---- conv1 taps via XLU roll + boundary mask (no pad scratch) -----------
    x_c = x_ref[...]                                              # (M, 1)
    x_p = jnp.where(is_first, 0.0, pltpu.roll(x_c, shift=1, axis=0))
    x_n = jnp.where(is_last, 0.0, pltpu.roll(x_c, shift=M - 1, axis=0))

    # ---- conv1 (Cin=1, k=3, pad=1): three VPU broadcast MACs (no im2col) ----
    pre1 = (x_p * w1_ref[0:1, :] + x_c * w1_ref[1:2, :]
            + x_n * w1_ref[2:3, :] + b1_ref[...])                 # (M, C1)

    # ---- BN1 (train mode, biased var) + ReLU: one-pass stats, folded scale --
    mu1 = jnp.sum(pre1, axis=0, keepdims=True) * inv_m
    ex1 = jnp.sum(pre1 * pre1, axis=0, keepdims=True) * inv_m
    var1 = jnp.maximum(ex1 - mu1 * mu1, 0.0)          # clamp f32 cancellation
    scale1 = g1_ref[...] * jax.lax.rsqrt(var1 + EPS)
    shift1 = bb1_ref[...] - mu1 * scale1
    h1 = jnp.maximum(pre1 * scale1 + shift1, 0.0)                 # (M, C1)

    # ---- conv2 taps via XLU roll + boundary mask ----------------------------
    h1_p = jnp.where(is_first, 0.0, pltpu.roll(h1, shift=1, axis=0))
    h1_n = jnp.where(is_last, 0.0, pltpu.roll(h1, shift=M - 1, axis=0))

    # ---- conv2 (C1 -> C2, k=3, pad=1): three K=C1 bf16 MXU matmuls, f32 acc -
    w2 = w2_ref[...]                                              # (3*C1, C2) bf16
    pre2 = jnp.dot(h1_p.astype(jnp.bfloat16), w2[0:C1, :],
                   preferred_element_type=jnp.float32)
    pre2 = pre2 + jnp.dot(h1.astype(jnp.bfloat16), w2[C1:2 * C1, :],
                          preferred_element_type=jnp.float32)
    pre2 = pre2 + jnp.dot(h1_n.astype(jnp.bfloat16), w2[2 * C1:3 * C1, :],
                          preferred_element_type=jnp.float32)
    pre2 = pre2 + b2_ref[...]                                     # (M, C2)

    # ---- BN2 + ReLU (one-pass, folded, clamped) -----------------------------
    mu2 = jnp.sum(pre2, axis=0, keepdims=True) * inv_m
    ex2 = jnp.sum(pre2 * pre2, axis=0, keepdims=True) * inv_m
    var2 = jnp.maximum(ex2 - mu2 * mu2, 0.0)
    scale2 = g2_ref[...] * jax.lax.rsqrt(var2 + EPS)
    shift2 = bb2_ref[...] - mu2 * scale2
    h2 = jnp.maximum(pre2 * scale2 + shift2, 0.0)                 # (M, C2)

    # ---- AdaptiveAvgPool1d(1): mean over L ----------------------------------
    pooled = jnp.mean(h2.reshape(N, L, C2), axis=1)               # (N, C2)

    # ---- fc1 + ReLU, fc2 (bf16 MXU, f32 acc; lane-padded output) ------------
    f1 = jnp.maximum(
        jnp.dot(pooled.astype(jnp.bfloat16), wf1_ref[...],
                preferred_element_type=jnp.float32) + bf1_ref[...], 0.0)
    out_ref[...] = (jnp.dot(f1.astype(jnp.bfloat16), wf2_ref[...],
                            preferred_element_type=jnp.float32) + bf2_ref[...])


def _vmem_limit_bytes(M, C1, C2, OC):
    """Scoped-VMEM budget sized from the resident buffers (2x headroom, <=48 MiB)."""
    ceil8 = lambda r: -(-r // 8) * 8
    ceil128 = lambda c: -(-c // 128) * 128
    f32 = lambda r, c: ceil8(r) * ceil128(c) * 4        # f32, (8,128) tiling
    bf16 = lambda r, c: -(-r // 16) * 16 * ceil128(c) * 2
    est = (3 * f32(M, 1)            # x column + rolled/masked taps
           + f32(M, 1)              # iota/mask column
           + 4 * f32(M, C1)         # pre1/h1 + rolled h1 taps
           + 3 * bf16(M, C1)        # bf16 conv2 LHS operands
           + 2 * f32(M, C2)         # pre2 / h2
           + f32(M, OC)             # slack for fc tail / temporaries
           + (2 << 20))             # weights, biases, misc
    return int(min(max(2 * est, 16 * 2**20), 48 * 2**20))


def cnnid_forward(x, kparams):
    """x: (N, 1, L) float32 (PyTorch NCL). Returns (N, num_classes)."""
    N, Cin, L = x.shape
    assert Cin == 1
    (w1, b1, g1, bb1, w2f, b2, g2, bb2, wf1, bf1, wf2, bf2) = kparams
    num_classes = bf2.shape[1]
    C1 = w1.shape[1]
    C2 = b2.shape[1]
    M = N * L

    # glue: flatten to a (N*L, 1) column; conv taps are built in-kernel
    x_col = x[:, 0, :].reshape(M, 1)

    # lane-dense output: class dim padded to a multiple of 128, sliced after
    OC = ((num_classes + 127) // 128) * 128
    wf2_p = jnp.pad(wf2, ((0, 0), (0, OC - num_classes))).astype(jnp.bfloat16)
    bf2_p = jnp.pad(bf2, ((0, 0), (0, OC - num_classes)))

    kernel = pl.pallas_call(
        functools.partial(cnnid_kernel, N=N, L=L),
        out_shape=jax.ShapeDtypeStruct((N, OC), jnp.float32),
        in_specs=[pl.BlockSpec(memory_space=pltpu.MemorySpace.VMEM)] * 13,
        out_specs=pl.BlockSpec(memory_space=pltpu.MemorySpace.VMEM),
        compiler_params=pltpu.CompilerParams(
            vmem_limit_bytes=_vmem_limit_bytes(M, C1, C2, OC)),
    )
    out = kernel(x_col, w1, b1, g1, bb1, w2f, b2, g2, bb2, wf1, bf1, wf2_p, bf2_p)
    return out[:, :num_classes]


def init_params(key, num_classes):
    """Deterministic synthetic parameters in PyTorch layouts + kernel layouts."""
    ks = jax.random.split(key, 12)
    conv1_w = 0.3 * jax.random.normal(ks[0], (32, 1, 3), jnp.float32)
    conv1_b = 0.1 * jax.random.normal(ks[1], (32,), jnp.float32)
    bn1_g = 1.0 + 0.1 * jax.random.normal(ks[2], (32,), jnp.float32)
    bn1_b = 0.1 * jax.random.normal(ks[3], (32,), jnp.float32)
    conv2_w = 0.1 * jax.random.normal(ks[4], (64, 32, 3), jnp.float32)
    conv2_b = 0.1 * jax.random.normal(ks[5], (64,), jnp.float32)
    bn2_g = 1.0 + 0.1 * jax.random.normal(ks[6], (64,), jnp.float32)
    bn2_b = 0.1 * jax.random.normal(ks[7], (64,), jnp.float32)
    fc1_w = 0.1 * jax.random.normal(ks[8], (64, 64), jnp.float32)
    fc1_b = 0.1 * jax.random.normal(ks[9], (64,), jnp.float32)
    fc2_w = 0.1 * jax.random.normal(ks[10], (num_classes, 64), jnp.float32)
    fc2_b = 0.1 * jax.random.normal(ks[11], (num_classes,), jnp.float32)

    torch_params = dict(conv1_w=conv1_w, conv1_b=conv1_b, bn1_g=bn1_g, bn1_b=bn1_b,
                        conv2_w=conv2_w, conv2_b=conv2_b, bn2_g=bn2_g, bn2_b=bn2_b,
                        fc1_w=fc1_w, fc1_b=fc1_b, fc2_w=fc2_w, fc2_b=fc2_b)

    # conv2 weight: (Cout, Cin, K) -> (K, Cin, Cout) -> (K*Cin, Cout) so the
    # kernel can take static (C1, C2) slices for the three per-tap matmuls.
    w2_kcio = jnp.transpose(conv2_w, (2, 1, 0))               # (3, 32, 64)
    w2_fused = w2_kcio.reshape(3 * 32, 64).astype(jnp.bfloat16)

    kparams = (
        jnp.transpose(conv1_w[:, 0, :], (1, 0)),              # (3, 32) f32 (VPU MACs)
        conv1_b.reshape(1, 32), bn1_g.reshape(1, 32), bn1_b.reshape(1, 32),
        w2_fused,
        conv2_b.reshape(1, 64), bn2_g.reshape(1, 64), bn2_b.reshape(1, 64),
        fc1_w.T.astype(jnp.bfloat16), fc1_b.reshape(1, 64),
        fc2_w.T, fc2_b.reshape(1, num_classes),
    )
    return torch_params, kparams


def reference_forward(x, tp):
    """Pure-JAX f32 reference matching the PyTorch forward (train-mode BN)."""
    def conv1d(h, w, b):
        y = jax.lax.conv_general_dilated(h, w, (1,), [(1, 1)],
                                         dimension_numbers=('NCH', 'OIH', 'NCH'))
        return y + b[None, :, None]

    def bn(h, g, b):
        mu = jnp.mean(h, axis=(0, 2), keepdims=True)
        var = jnp.mean((h - mu) ** 2, axis=(0, 2), keepdims=True)
        return (h - mu) / jnp.sqrt(var + EPS) * g[None, :, None] + b[None, :, None]

    h = jax.nn.relu(bn(conv1d(x, tp['conv1_w'], tp['conv1_b']), tp['bn1_g'], tp['bn1_b']))
    h = jax.nn.relu(bn(conv1d(h, tp['conv2_w'], tp['conv2_b']), tp['bn2_g'], tp['bn2_b']))
    p = jnp.mean(h, axis=2)
    f = jax.nn.relu(p @ tp['fc1_w'].T + tp['fc1_b'])
    return f @ tp['fc2_w'].T + tp['fc2_b']


if __name__ == "__main__":
    # NOTE: this size (M = N*L = 32) is a correctness smoke test only; the
    # lane-density / VMEM arguments in the kernel design matter at M >> 1e4.
    N, L, num_classes = 2, 16, 10
    key = jax.random.PRNGKey(0)
    kx, kp = jax.random.split(key)
    x = jax.random.normal(kx, (N, 1, L), jnp.float32)

    torch_params, kparams = init_params(kp, num_classes)

    out = cnnid_forward(x, kparams)
    out = jax.block_until_ready(out)

    ref = reference_forward(x, torch_params)
    assert out.shape == (N, num_classes)
    # Tolerance accounts for bf16 MXU operands (f32 accumulation) vs f32 reference.
    if not bool(jnp.allclose(out, ref, atol=2e-2, rtol=2e-2)):
        err = float(jnp.max(jnp.abs(out - ref)))
        raise AssertionError(f"mismatch (max abs err {err}):\nkernel={out}\nref={ref}")
    print("KERNEL_OK")
</pallas_src>

<mosaic_0001>
module attributes {stable_mosaic.version = 11 : i64} {
  func.func @cnnid_kernel(%arg0: memref<32x1xf32, #tpu.memory_space<vmem>>, %arg1: memref<3x32xf32, #tpu.memory_space<vmem>>, %arg2: memref<1x32xf32, #tpu.memory_space<vmem>>, %arg3: memref<1x32xf32, #tpu.memory_space<vmem>>, %arg4: memref<1x32xf32, #tpu.memory_space<vmem>>, %arg5: memref<96x64xbf16, #tpu.memory_space<vmem>>, %arg6: memref<1x64xf32, #tpu.memory_space<vmem>>, %arg7: memref<1x64xf32, #tpu.memory_space<vmem>>, %arg8: memref<1x64xf32, #tpu.memory_space<vmem>>, %arg9: memref<64x64xbf16, #tpu.memory_space<vmem>>, %arg10: memref<1x64xf32, #tpu.memory_space<vmem>>, %arg11: memref<64x128xbf16, #tpu.memory_space<vmem>>, %arg12: memref<1x128xf32, #tpu.memory_space<vmem>>, %arg13: memref<2x128xf32, #tpu.memory_space<vmem>>) attributes {dimension_semantics = [], scalar_prefetch = 0 : i64, scratch_operands = 0 : i64, tpu.core_type = #tpu.core_type<tc>} {
    %0 = tpu.iota {dimensions = array<i32: 0>} : vector<32x1xi32>
    %c16_i32 = arith.constant 16 : i32
    %c0_i32 = arith.constant 0 : i32
    %1 = arith.cmpi eq, %c16_i32, %c0_i32 : i32
    %c1_i32 = arith.constant 1 : i32
    %2 = arith.select %1, %c1_i32, %c16_i32 : i32
    %3 = vector.broadcast %2 : i32 to vector<32x1xi32>
    %4 = arith.remsi %0, %3 : vector<32x1xi32>
    %c0_i32_0 = arith.constant 0 : i32
    %5 = vector.broadcast %c0_i32_0 : i32 to vector<32x1xi32>
    %6 = arith.cmpi ne, %4, %5 : vector<32x1xi32>
    %c0_i32_1 = arith.constant 0 : i32
    %7 = vector.broadcast %c0_i32_1 : i32 to vector<32x1xi32>
    %8 = arith.cmpi slt, %4, %7 : vector<32x1xi32>
    %c0_i32_2 = arith.constant 0 : i32
    %9 = arith.cmpi slt, %2, %c0_i32_2 : i32
    %10 = vector.broadcast %9 : i1 to vector<32x1xi1>
    %11 = vector.broadcast %10 : vector<32x1xi1> to vector<32x1xi1>
    %12 = arith.xori %8, %11 : vector<32x1xi1>
    %13 = arith.andi %12, %6 : vector<32x1xi1>
    %14 = vector.broadcast %2 : i32 to vector<32x1xi32>
    %15 = arith.addi %4, %14 : vector<32x1xi32>
    %16 = arith.select %13, %15, %4 : vector<32x1xi1>, vector<32x1xi32>
    %c0_i32_3 = arith.constant 0 : i32
    %17 = vector.broadcast %c0_i32_3 : i32 to vector<32x1xi32>
    %18 = arith.cmpi eq, %16, %17 : vector<32x1xi32>
    %c15_i32 = arith.constant 15 : i32
    %19 = vector.broadcast %c15_i32 : i32 to vector<32x1xi32>
    %20 = arith.cmpi eq, %16, %19 : vector<32x1xi32>
    %c0 = arith.constant 0 : index
    %c0_4 = arith.constant 0 : index
    %21 = vector.load %arg0[%c0, %c0_4] : memref<32x1xf32, #tpu.memory_space<vmem>>, vector<32x1xf32>
    %c1_i32_5 = arith.constant 1 : i32
    %22 = tpu.dynamic_rotate %21 by %c1_i32_5 dim 0 : vector<32x1xf32>, i32 -> vector<32x1xf32>
    %cst = arith.constant 0.000000e+00 : f32
    %23 = vector.broadcast %cst : f32 to vector<32x1xf32>
    %24 = arith.select %18, %23, %22 : vector<32x1xi1>, vector<32x1xf32>
    %c31_i32 = arith.constant 31 : i32
    %25 = tpu.dynamic_rotate %21 by %c31_i32 dim 0 : vector<32x1xf32>, i32 -> vector<32x1xf32>
    %cst_6 = arith.constant 0.000000e+00 : f32
    %26 = vector.broadcast %cst_6 : f32 to vector<32x1xf32>
    %27 = arith.select %20, %26, %25 : vector<32x1xi1>, vector<32x1xf32>
    %c0_7 = arith.constant 0 : index
    %c0_8 = arith.constant 0 : index
    %28 = vector.load %arg1[%c0_7, %c0_8] : memref<3x32xf32, #tpu.memory_space<vmem>>, vector<1x32xf32>
    %29 = vector.broadcast %24 : vector<32x1xf32> to vector<32x32xf32>
    %30 = vector.broadcast %28 : vector<1x32xf32> to vector<32x32xf32>
    %31 = arith.mulf %29, %30 : vector<32x32xf32>
    %c1 = arith.constant 1 : index
    %c0_9 = arith.constant 0 : index
    %32 = vector.load %arg1[%c1, %c0_9] : memref<3x32xf32, #tpu.memory_space<vmem>>, vector<1x32xf32>
    %33 = vector.broadcast %21 : vector<32x1xf32> to vector<32x32xf32>
    %34 = vector.broadcast %32 : vector<1x32xf32> to vector<32x32xf32>
    %35 = arith.mulf %33, %34 : vector<32x32xf32>
    %36 = arith.addf %31, %35 : vector<32x32xf32>
    %c2 = arith.constant 2 : index
    %c0_10 = arith.constant 0 : index
    %37 = vector.load %arg1[%c2, %c0_10] : memref<3x32xf32, #tpu.memory_space<vmem>>, vector<1x32xf32>
    %38 = vector.broadcast %27 : vector<32x1xf32> to vector<32x32xf32>
    %39 = vector.broadcast %37 : vector<1x32xf32> to vector<32x32xf32>
    %40 = arith.mulf %38, %39 : vector<32x32xf32>
    %41 = arith.addf %36, %40 : vector<32x32xf32>
    %c0_11 = arith.constant 0 : index
    %c0_12 = arith.constant 0 : index
    %42 = vector.load %arg2[%c0_11, %c0_12] : memref<1x32xf32, #tpu.memory_space<vmem>>, vector<1x32xf32>
    %43 = vector.broadcast %42 : vector<1x32xf32> to vector<32x32xf32>
    %44 = arith.addf %41, %43 : vector<32x32xf32>
    %cst_13 = arith.constant dense<0.000000e+00> : vector<32xf32>
    %45 = vector.multi_reduction <add>, %44, %cst_13 [0] : vector<32x32xf32> to vector<32xf32>
    %46 = vector.shape_cast %45 : vector<32xf32> to vector<1x32xf32>
    %cst_14 = arith.constant 3.125000e-02 : f32
    %47 = vector.broadcast %cst_14 : f32 to vector<1x32xf32>
    %48 = arith.mulf %46, %47 : vector<1x32xf32>
    %49 = arith.mulf %44, %44 : vector<32x32xf32>
    %cst_15 = arith.constant dense<0.000000e+00> : vector<32xf32>
    %50 = vector.multi_reduction <add>, %49, %cst_15 [0] : vector<32x32xf32> to vector<32xf32>
    %51 = vector.shape_cast %50 : vector<32xf32> to vector<1x32xf32>
    %cst_16 = arith.constant 3.125000e-02 : f32
    %52 = vector.broadcast %cst_16 : f32 to vector<1x32xf32>
    %53 = arith.mulf %51, %52 : vector<1x32xf32>
    %54 = arith.mulf %48, %48 : vector<1x32xf32>
    %55 = arith.subf %53, %54 : vector<1x32xf32>
    %cst_17 = arith.constant 0.000000e+00 : f32
    %56 = vector.broadcast %cst_17 : f32 to vector<1x32xf32>
    %57 = arith.maximumf %55, %56 : vector<1x32xf32>
    %c0_18 = arith.constant 0 : index
    %c0_19 = arith.constant 0 : index
    %58 = vector.load %arg3[%c0_18, %c0_19] : memref<1x32xf32, #tpu.memory_space<vmem>>, vector<1x32xf32>
    %cst_20 = arith.constant 9.99999974E-6 : f32
    %59 = vector.broadcast %cst_20 : f32 to vector<1x32xf32>
    %60 = arith.addf %57, %59 : vector<1x32xf32>
    %61 = math.rsqrt %60 : vector<1x32xf32>
    %62 = arith.mulf %58, %61 : vector<1x32xf32>
    %c0_21 = arith.constant 0 : index
    %c0_22 = arith.constant 0 : index
    %63 = vector.load %arg4[%c0_21, %c0_22] : memref<1x32xf32, #tpu.memory_space<vmem>>, vector<1x32xf32>
    %64 = arith.mulf %48, %62 : vector<1x32xf32>
    %65 = arith.subf %63, %64 : vector<1x32xf32>
    %66 = vector.broadcast %62 : vector<1x32xf32> to vector<32x32xf32>
    %67 = arith.mulf %44, %66 : vector<32x32xf32>
    %68 = vector.broadcast %65 : vector<1x32xf32> to vector<32x32xf32>
    %69 = arith.addf %67, %68 : vector<32x32xf32>
    %cst_23 = arith.constant 0.000000e+00 : f32
    %70 = vector.broadcast %cst_23 : f32 to vector<32x32xf32>
    %71 = arith.maximumf %69, %70 : vector<32x32xf32>
    %c1_i32_24 = arith.constant 1 : i32
    %72 = tpu.dynamic_rotate %71 by %c1_i32_24 dim 0 : vector<32x32xf32>, i32 -> vector<32x32xf32>
    %cst_25 = arith.constant 0.000000e+00 : f32
    %73 = vector.shape_cast %18 : vector<32x1xi1> to vector<32x1xi1>
    %74 = vector.broadcast %73 : vector<32x1xi1> to vector<32x32xi1>
    %75 = vector.broadcast %cst_25 : f32 to vector<32x32xf32>
    %76 = arith.select %74, %75, %72 : vector<32x32xi1>, vector<32x32xf32>
    %c31_i32_26 = arith.constant 31 : i32
    %77 = tpu.dynamic_rotate %71 by %c31_i32_26 dim 0 : vector<32x32xf32>, i32 -> vector<32x32xf32>
    %cst_27 = arith.constant 0.000000e+00 : f32
    %78 = vector.shape_cast %20 : vector<32x1xi1> to vector<32x1xi1>
    %79 = vector.broadcast %78 : vector<32x1xi1> to vector<32x32xi1>
    %80 = vector.broadcast %cst_27 : f32 to vector<32x32xf32>
    %81 = arith.select %79, %80, %77 : vector<32x32xi1>, vector<32x32xf32>
    %c0_28 = arith.constant 0 : index
    %c0_29 = arith.constant 0 : index
    %82 = vector.load %arg5[%c0_28, %c0_29] : memref<96x64xbf16, #tpu.memory_space<vmem>>, vector<96x64xbf16>
    %83 = arith.truncf %76 : vector<32x32xf32> to vector<32x32xbf16>
    %84 = vector.extract_strided_slice %82 {offsets = [0, 0], sizes = [32, 64], strides = [1, 1]} : vector<96x64xbf16> to vector<32x64xbf16>
    %cst_30 = arith.constant dense<0.000000e+00> : vector<32x64xf32>
    %85 = tpu.matmul %83, %84, %cst_30 {dimension_numbers = #tpu.dot_dimension_numbers<[1], [0], [0], [1], [0, 0, 1, 1], [], []>} : vector<32x32xbf16>, vector<32x64xbf16>, vector<32x64xf32> -> vector<32x64xf32>
    %86 = arith.truncf %71 : vector<32x32xf32> to vector<32x32xbf16>
    %87 = vector.extract_strided_slice %82 {offsets = [32, 0], sizes = [32, 64], strides = [1, 1]} : vector<96x64xbf16> to vector<32x64xbf16>
    %cst_31 = arith.constant dense<0.000000e+00> : vector<32x64xf32>
    %88 = tpu.matmul %86, %87, %cst_31 {dimension_numbers = #tpu.dot_dimension_numbers<[1], [0], [0], [1], [0, 0, 1, 1], [], []>} : vector<32x32xbf16>, vector<32x64xbf16>, vector<32x64xf32> -> vector<32x64xf32>
    %89 = arith.addf %85, %88 : vector<32x64xf32>
    %90 = arith.truncf %81 : vector<32x32xf32> to vector<32x32xbf16>
    %91 = vector.extract_strided_slice %82 {offsets = [64, 0], sizes = [32, 64], strides = [1, 1]} : vector<96x64xbf16> to vector<32x64xbf16>
    %cst_32 = arith.constant dense<0.000000e+00> : vector<32x64xf32>
    %92 = tpu.matmul %90, %91, %cst_32 {dimension_numbers = #tpu.dot_dimension_numbers<[1], [0], [0], [1], [0, 0, 1, 1], [], []>} : vector<32x32xbf16>, vector<32x64xbf16>, vector<32x64xf32> -> vector<32x64xf32>
    %93 = arith.addf %89, %92 : vector<32x64xf32>
    %c0_33 = arith.constant 0 : index
    %c0_34 = arith.constant 0 : index
    %94 = vector.load %arg6[%c0_33, %c0_34] : memref<1x64xf32, #tpu.memory_space<vmem>>, vector<1x64xf32>
    %95 = vector.broadcast %94 : vector<1x64xf32> to vector<32x64xf32>
    %96 = arith.addf %93, %95 : vector<32x64xf32>
    %cst_35 = arith.constant dense<0.000000e+00> : vector<64xf32>
    %97 = vector.multi_reduction <add>, %96, %cst_35 [0] : vector<32x64xf32> to vector<64xf32>
    %98 = vector.shape_cast %97 : vector<64xf32> to vector<1x64xf32>
    %cst_36 = arith.constant 3.125000e-02 : f32
    %99 = vector.broadcast %cst_36 : f32 to vector<1x64xf32>
    %100 = arith.mulf %98, %99 : vector<1x64xf32>
    %101 = arith.mulf %96, %96 : vector<32x64xf32>
    %cst_37 = arith.constant dense<0.000000e+00> : vector<64xf32>
    %102 = vector.multi_reduction <add>, %101, %cst_37 [0] : vector<32x64xf32> to vector<64xf32>
    %103 = vector.shape_cast %102 : vector<64xf32> to vector<1x64xf32>
    %cst_38 = arith.constant 3.125000e-02 : f32
    %104 = vector.broadcast %cst_38 : f32 to vector<1x64xf32>
    %105 = arith.mulf %103, %104 : vector<1x64xf32>
    %106 = arith.mulf %100, %100 : vector<1x64xf32>
    %107 = arith.subf %105, %106 : vector<1x64xf32>
    %cst_39 = arith.constant 0.000000e+00 : f32
    %108 = vector.broadcast %cst_39 : f32 to vector<1x64xf32>
    %109 = arith.maximumf %107, %108 : vector<1x64xf32>
    %c0_40 = arith.constant 0 : index
    %c0_41 = arith.constant 0 : index
    %110 = vector.load %arg7[%c0_40, %c0_41] : memref<1x64xf32, #tpu.memory_space<vmem>>, vector<1x64xf32>
    %cst_42 = arith.constant 9.99999974E-6 : f32
    %111 = vector.broadcast %cst_42 : f32 to vector<1x64xf32>
    %112 = arith.addf %109, %111 : vector<1x64xf32>
    %113 = math.rsqrt %112 : vector<1x64xf32>
    %114 = arith.mulf %110, %113 : vector<1x64xf32>
    %c0_43 = arith.constant 0 : index
    %c0_44 = arith.constant 0 : index
    %115 = vector.load %arg8[%c0_43, %c0_44] : memref<1x64xf32, #tpu.memory_space<vmem>>, vector<1x64xf32>
    %116 = arith.mulf %100, %114 : vector<1x64xf32>
    %117 = arith.subf %115, %116 : vector<1x64xf32>
    %118 = vector.broadcast %114 : vector<1x64xf32> to vector<32x64xf32>
    %119 = arith.mulf %96, %118 : vector<32x64xf32>
    %120 = vector.broadcast %117 : vector<1x64xf32> to vector<32x64xf32>
    %121 = arith.addf %119, %120 : vector<32x64xf32>
    %cst_45 = arith.constant 0.000000e+00 : f32
    %122 = vector.broadcast %cst_45 : f32 to vector<32x64xf32>
    %123 = arith.maximumf %121, %122 : vector<32x64xf32>
    %124 = vector.shape_cast %123 : vector<32x64xf32> to vector<2x16x64xf32>
    %cst_46 = arith.constant dense<0.000000e+00> : vector<2x64xf32>
    %125 = vector.multi_reduction <add>, %124, %cst_46 [1] : vector<2x16x64xf32> to vector<2x64xf32>
    %cst_47 = arith.constant 1.600000e+01 : f32
    %126 = vector.broadcast %cst_47 : f32 to vector<2x64xf32>
    %127 = arith.divf %125, %126 : vector<2x64xf32>
    %128 = arith.truncf %127 : vector<2x64xf32> to vector<2x64xbf16>
    %c0_48 = arith.constant 0 : index
    %c0_49 = arith.constant 0 : index
    %129 = vector.load %arg9[%c0_48, %c0_49] : memref<64x64xbf16, #tpu.memory_space<vmem>>, vector<64x64xbf16>
    %cst_50 = arith.constant dense<0.000000e+00> : vector<2x64xf32>
    %130 = tpu.matmul %128, %129, %cst_50 {dimension_numbers = #tpu.dot_dimension_numbers<[1], [0], [0], [1], [0, 0, 1, 1], [], []>} : vector<2x64xbf16>, vector<64x64xbf16>, vector<2x64xf32> -> vector<2x64xf32>
    %c0_51 = arith.constant 0 : index
    %c0_52 = arith.constant 0 : index
    %131 = vector.load %arg10[%c0_51, %c0_52] : memref<1x64xf32, #tpu.memory_space<vmem>>, vector<1x64xf32>
    %132 = vector.broadcast %131 : vector<1x64xf32> to vector<2x64xf32>
    %133 = arith.addf %130, %132 : vector<2x64xf32>
    %cst_53 = arith.constant 0.000000e+00 : f32
    %134 = vector.broadcast %cst_53 : f32 to vector<2x64xf32>
    %135 = arith.maximumf %133, %134 : vector<2x64xf32>
    %136 = arith.truncf %135 : vector<2x64xf32> to vector<2x64xbf16>
    %c0_54 = arith.constant 0 : index
    %c0_55 = arith.constant 0 : index
    %137 = vector.load %arg11[%c0_54, %c0_55] : memref<64x128xbf16, #tpu.memory_space<vmem>>, vector<64x128xbf16>
    %cst_56 = arith.constant dense<0.000000e+00> : vector<2x128xf32>
    %138 = tpu.matmul %136, %137, %cst_56 {dimension_numbers = #tpu.dot_dimension_numbers<[1], [0], [0], [1], [0, 0, 1, 1], [], []>} : vector<2x64xbf16>, vector<64x128xbf16>, vector<2x128xf32> -> vector<2x128xf32>
    %c0_57 = arith.constant 0 : index
    %c0_58 = arith.constant 0 : index
    %139 = vector.load %arg12[%c0_57, %c0_58] : memref<1x128xf32, #tpu.memory_space<vmem>>, vector<1x128xf32>
    %140 = vector.broadcast %139 : vector<1x128xf32> to vector<2x128xf32>
    %141 = arith.addf %138, %140 : vector<2x128xf32>
    %c0_59 = arith.constant 0 : index
    %c0_60 = arith.constant 0 : index
    %142 = vector.load %arg13[%c0_59, %c0_60] : memref<2x128xf32, #tpu.memory_space<vmem>>, vector<2x128xf32>
    tpu.vector_store %arg13[%c0_59, %c0_60], %141 {strides = array<i32>} : memref<2x128xf32, #tpu.memory_space<vmem>>, vector<2x128xf32>,
    return
  }
}

</mosaic_0001>

<bundles_post_ra>
// kernel: tpu_custom_call.1
= control target key start
LH: loop header
LB: loop body
LE: loop exit
PB: predicated region body
PF: predicated region fallthrough
CT: control target
= control target key end

     0   :  { %v46_v1 = vlaneseq  ;;  %v834_v4 = vmov 0   ;;  %s1133_s0 = inlined_call_operand.vmem [shape: f32[32,1], index: 0, kind: input, shape index: {}]   ;;  %s1134_s1 = inlined_call_operand.vmem [shape: f32[3,32], index: 1, kind: input, shape index: {}]   ;;  %s1135_s2 = inlined_call_operand.vmem [shape: f32[1,32], index: 2, kind: input, shape index: {}]   ;;  %s1136_s3 = inlined_call_operand.vmem [shape: f32[1,32], index: 3, kind: input, shape index: {}]   ;;  %s1137_s4 = inlined_call_operand.vmem [shape: f32[1,32], index: 4, kind: input, shape index: {}]   ;;  %s1138_s5 = inlined_call_operand.vmem [shape: bf16[96,64], index: 5, kind: input, shape index: {}]   ;;  %s1139_s6 = inlined_call_operand.vmem [shape: f32[1,64], index: 6, kind: input, shape index: {}]   ;;  %s1140_s7 = inlined_call_operand.vmem [shape: f32[1,64], index: 7, kind: input, shape index: {}]   ;;  %s1141_s8 = inlined_call_operand.vmem [shape: f32[1,64], index: 8, kind: input, shape index: {}]   ;;  %s1142_s9 = inlined_call_operand.vmem [shape: bf16[64,64], index: 9, kind: input, shape index: {}]   ;;  %s1143_s10 = inlined_call_operand.vmem [shape: f32[1,64], index: 10, kind: input, shape index: {}]   ;;  %s1144_s11 = inlined_call_operand.vmem [shape: bf16[64,128], index: 11, kind: input, shape index: {}]   ;;  %s1145_s12 = inlined_call_operand.vmem [shape: f32[1,128], index: 12, kind: input, shape index: {}]   ;;  %s1146_s13 = inlined_call_operand.hbm [shape: f32[2,128], index: 13, kind: output, shape index: {}]  }
   0x1   :  { %v107_v0 = vld [vmem:[%s1133_s0] sm:$0xff]  ;;  %v108_v2 = vld [vmem:[%s1133_s0 + $0x8] sm:$0xff]  ;;  %v109_v3 = vld [vmem:[%s1133_s0 + $0x10] sm:$0xff]  ;;  %793 = vset.pattern.permute.xlu1 %v834_v4  ;;  %792 = vset.pattern.permute.xlu0 %v834_v4 }
   0x2   :  { %v111_v5 = vrot.slane %v107_v0, 7  ;;  %v112_v6 = vrot.slane %v108_v2, 7  ;;  %v110_v7 = vld [vmem:[%s1133_s0 + $0x18] sm:$0xff]  ;;  %166 = vperm.xlu1 %793, %v107_v0   ;;  %v919_v8 = vshrl.u32 %v46_v1, 7  ;;  %794 = vset.pattern.permute.xlu2 %v834_v4  ;;  %v113_v9 = vrot.slane %v109_v3, 7 }
   0x3   :  { %176 = vperm.xlu2 %794, %v109_v3   ;;  %v114_v10 = vrot.slane %v110_v7, 7  ;;  %v126_v17 = vrot.slane %v109_v3, 1  ;;  %v125_v18 = vrot.slane %v108_v2, 1 }
   0x4   :  { %vm115_vm0 = vcmp.lt.s32.totalorder %v919_v8, 1  ;;  %v55_v11 = vand.u32 15, %v919_v8  ;;  %v49_v12 = vadd.s32 16, %v919_v8  ;;  %v48_v13 = vadd.s32 8, %v919_v8 }
   0x5   :  { %v118_v14 = vsel %vm115_vm0, %v111_v5, %v112_v6  ;;  %v117_v16 = vsel %vm115_vm0, %v112_v6, %v113_v9 }
   0x6   :  { %145 = vperm.xlu0 %792, %v118_v14   ;;  %v69_v15 = vand.u32 15, %v49_v12 }
   0x7   :  { %18 = vsyncpa [#allocation3], 0  ;;  %vm929_vm1 = vcmp.eq.s32.totalorder %v55_v11, 0  ;;  %v119_v20 = vsel %vm115_vm0, %v114_v10, %v111_v5  ;;  %v62_v22 = vand.u32 15, %v48_v13  ;;  %vm128_vm3 = vcmp.lt.s32.totalorder %v919_v8, 7 }
   0x8   :  { %vm935_vm2 = vcmp.eq.s32.totalorder %v69_v15, 0  ;;  %v120_v24 = vsel %vm929_vm1, 0.0, %v119_v20  ;;  %v130_v26 = vsel %vm128_vm3, %v125_v18, %v126_v17  ;;  %v50_v27 = vadd.s32 24, %v919_v8  ;;  %v795_v44 = vld [vmem:[%s1134_s1 + $0x1] ss:$0 sm:$0xff] }
   0x9   :  { %v122_v23 = vsel %vm935_vm2, 0.0, %v117_v16  ;;  %vm944_vm4 = vcmp.eq.s32.totalorder %v62_v22, 15  ;;  %v124_v28 = vrot.slane %v107_v0, 1  ;;  %v116_v30 = vsel %vm115_vm0, %v113_v9, %v114_v10  ;;  %v796_v45 = vld [vmem:[%s1134_s1] ss:$0 sm:$0xff] }
   0xa   :  { %171 = vperm.xlu1 %793, %v108_v2   ;;  %v134_v29 = vsel %vm944_vm4, 0.0, %v130_v26  ;;  %v76_v31 = vand.u32 15, %v50_v27  ;;  %v127_v33 = vrot.slane %v110_v7, 1  ;;  %v797_v48 = vld [vmem:[%s1134_s1 + $0x2] ss:$0 sm:$0xff]  ;;  %vm231_vm6 = vcmask 261120  }
   0xb   :  { %150 = vperm.xlu2 %794, %v122_v23   ;;  %v131_v32 = vsel %vm128_vm3, %v124_v28, %v125_v18  ;;  %v798_v60 = vld [vmem:[%s1135_s2] ss:$0 sm:$0xff]  ;;  %vm482_vm10 = vcmask 523264   ;;  %vm597_vm15 = vcmask 1041409  }
   0xc   :  { %vm957_vm5 = vcmp.eq.s32.totalorder %v76_v31, 15  ;;  %v132_v35 = vsel %vm128_vm3, %v127_v33, %v124_v28  ;;  %v129_v36 = vsel %vm128_vm3, %v126_v17, %v127_v33  ;;  %v799_v34 = vld [vmem:[%s1139_s6] ss:$0 sm:$0xff]  ;;  %s702_s6 = sshll.u32 %s1146_s13, 4  ;;  %s703_s6 = int_to_ptr.hbm [resolvable:$true] %s702_s6 }
   0xd   :  { %v136_v37 = vsel %vm957_vm5, 0.0, %v132_v35 }
   0xe   :  { %140 = vperm.xlu0 %792, %v120_v24  }
  0x12   :  { %201 = vperm.xlu1 %793, %v134_v29  }
  0x13   :  { %155 = vperm.xlu2 %794, %v116_v30  }
  0x16   :  { %196 = vperm.xlu0 %792, %v131_v32  }
  0x1a   :  { %206 = vperm.xlu1 %793, %v129_v36  }
  0x1b   :  { %211 = vperm.xlu2 %794, %v136_v37  }
  0x1e   :  { %181 = vperm.xlu0 %792, %v110_v7  }
  0x5d   :  { %v177_v38 = vpop.permute.xlu2 %176 }
  0x5e   :  { %v187_v54 = vmul.f32 %v795_v44, %v177_v38 }
  0x65   :  { %v151_v41 = vpop.permute.xlu2 %150 }
  0x66   :  { %v161_v56 = vmul.f32 %v796_v45, %v151_v41 }
  0x68   :  { %v191_v0 = vadd.f32 %v187_v54, %v161_v56  ;;  %v777_v54 = vld [vmem:[%s1138_s5 + $0x10] sm:$0xff]  ;;  %v780_v56 = vld [vmem:[%s1138_s5 + $0x28] sm:$0xff] }
  0x69   :  { %457 = vmatpush.bf16.msra.mxu2 %v780_v56 }
  0x6d   :  { %v156_v47 = vpop.permute.xlu2 %155 }
  0x6e   :  { %v162_v7 = vmul.f32 %v796_v45, %v156_v47 }
  0x74   :  { %v167_v39 = vpop.permute.xlu1 %166 }
  0x75   :  { %v185_v51 = vmul.f32 %v795_v44, %v167_v39  ;;  %v212_v3 = vpop.permute.xlu2 %211 }
  0x76   :  { %v218_v12 = vmul.f32 %v797_v48, %v212_v3  ;;  %v267_v3 = vld [vmem:[%s1136_s3] sm:$0x1] }
  0x78   :  { %v146_v40 = vpop.permute.xlu0 %145 }
  0x79   :  { %v160_v52 = vmul.f32 %v796_v45, %v146_v40 }
  0x7c   :  { %v172_v42 = vpop.permute.xlu1 %171 }
  0x7d   :  { %v186_v49 = vmul.f32 %v795_v44, %v172_v42 }
  0x7f   :  { %v190_v57 = vadd.f32 %v186_v49, %v160_v52 }
  0x80   :  { %v141_v43 = vpop.permute.xlu0 %140 }
  0x81   :  { %v159_v50 = vmul.f32 %v796_v45, %v141_v43 }
  0x83   :  { %v189_v58 = vadd.f32 %v185_v51, %v159_v50  ;;  %v778_v50 = vld [vmem:[%s1138_s5 + $0x18] sm:$0xff] }
  0x84   :  { %v202_v46 = vpop.permute.xlu1 %201  ;;  %381 = vmatpush.bf16.msra.mxu0 %v778_v50 }
  0x85   :  { %v216_v53 = vmul.f32 %v797_v48, %v202_v46 }
  0x87   :  { %v220_v61 = vadd.f32 %v216_v53, %v190_v57 }
  0x88   :  { %v197_v55 = vpop.permute.xlu0 %196  ;;  %382 = vmatpush.bf16.msra.mxu0 %v777_v54 }
  0x89   :  { %v215_v59 = vmul.f32 %v797_v48, %v197_v55  ;;  %v981_v4 = vadd.f32 %v798_v60, %v220_v61  ;;  %v776_v55 = vld [vmem:[%s1138_s5 + $0x8] sm:$0xff] }
  0x8a   :  { %418 = vmatpush.bf16.msra.mxu1 %v776_v55 }
  0x8b   :  { %v219_v62 = vadd.f32 %v215_v59, %v189_v58  ;;  %v247_v13 = vmul.f32 %v981_v4, %v981_v4  ;;  %v233_v17 = vsel %vm231_vm6, %v981_v4, 0.0  ;;  %v775_v59 = vld [vmem:[%s1138_s5] sm:$0xff] }
  0x8c   :  { %v207_v63 = vpop.permute.xlu1 %206 }
  0x8d   :  { %v979_v1 = vadd.f32 %v798_v60, %v219_v62  ;;  %v217_v2 = vmul.f32 %v797_v48, %v207_v63  ;;  %v251_v24 = vsel %vm231_vm6, %v247_v13, 0.0 }
  0x8e   :  { %419 = vmatpush.bf16.msra.mxu1 %v775_v59 }
  0x8f   :  { %v221_v5 = vadd.f32 %v217_v2, %v191_v0  ;;  %v246_v9 = vmul.f32 %v979_v1, %v979_v1  ;;  %v232_v14 = vsel %vm231_vm6, %v979_v1, 0.0 }
  0x90   :  { %v182_v6 = vpop.permute.xlu0 %181  ;;  %v234_v23 = vadd.f32 %v233_v17, %v232_v14 }
  0x91   :  { %v985_v10 = vadd.f32 %v798_v60, %v221_v5  ;;  %v188_v11 = vmul.f32 %v795_v44, %v182_v6  ;;  %v250_v18 = vsel %vm231_vm6, %v246_v9, 0.0  ;;  %v280_v9 = vld [vmem:[%s1137_s4] sm:$0x1] }
  0x92   :  { %v252_v28 = vadd.f32 %v251_v24, %v250_v18 }
  0x93   :  { %v248_v15 = vmul.f32 %v985_v10, %v985_v10  ;;  %v192_v16 = vadd.f32 %v188_v11, %v162_v7  ;;  %v235_v20 = vsel %vm231_vm6, %v985_v10, 0.0 }
  0x94   :  { %v236_v29 = vadd.f32 %v235_v20, %v234_v23 }
  0x95   :  { %v222_v22 = vadd.f32 %v218_v12, %v192_v16  ;;  %v253_v26 = vsel %vm231_vm6, %v248_v15, 0.0 }
  0x96   :  { %v254_v32 = vadd.f32 %v253_v26, %v252_v28 }
  0x97   :  { %v230_v27 = vadd.f32 %v798_v60, %v222_v22  ;;  %v779_v60 = vld [vmem:[%s1138_s5 + $0x20] sm:$0xff]  ;;  %s836_s5 = smov [#allocation2]  }
  0x98   :  { %458 = vmatpush.bf16.msra.mxu2 %v779_v60  ;;  %s700_s3 = sshll.u32 %s836_s5, 4  ;;  %s701_s3 = int_to_ptr.vmem [resolvable:$true] %s700_s3 }
  0x99   :  { %v237_v30 = vsel %vm231_vm6, %v230_v27, 0.0  ;;  %v249_v31 = vmul.f32 %v230_v27, %v230_v27 }
  0x9a   :  { %v238_v33 = vadd.f32 %v237_v30, %v236_v29 }
  0x9b   :  { %v255_v35 = vsel %vm231_vm6, %v249_v31, 0.0 }
  0x9c   :  { %v239_v36 = vrot.slane %v238_v33, 4  ;;  %v256_v37 = vadd.f32 %v255_v35, %v254_v32 }
  0x9e   :  { %v240_v38 = vadd.f32 %v239_v36, %v238_v33  ;;  %v257_v39 = vrot.slane %v256_v37, 4 }
  0xa0   :  { %v241_v40 = vrot.slane %v240_v38, 2  ;;  %v258_v41 = vadd.f32 %v257_v39, %v256_v37 }
  0xa2   :  { %v242_v42 = vadd.f32 %v241_v40, %v240_v38  ;;  %v259_v43 = vrot.slane %v258_v41, 2 }
  0xa4   :  { %v243_v44 = vrot.slane %v242_v42, 1  ;;  %v260_v45 = vadd.f32 %v259_v43, %v258_v41 }
  0xa6   :  { %v244_v46 = vadd.f32 %v243_v44, %v242_v42  ;;  %v261_v47 = vrot.slane %v260_v45, 1 }
  0xa8   :  { %v245_v48 = vmul.f32 0.03125, %v244_v46  ;;  %v262_v49 = vadd.f32 %v261_v47, %v260_v45 }
  0xaa   :  { %v263_v51 = vmul.f32 0.03125, %v262_v49  ;;  %v264_v52 = vmul.f32 %v245_v48, %v245_v48 }
  0xac   :  { %v265_v53 = vsub.f32 %v263_v51, %v264_v52 }
  0xae   :  { %v266_v57 = vmax.f32 %v265_v53, 0.0 }
  0xb0   :  { %v268_v58 = vadd.f32 1e-05, %v266_v57 }
  0xb2   :  { %802 = vrsqrt.f32 %v268_v58  ;;  %vm275_vm8 = vweird.f32 %v268_v58 }
  0xb8   :  { %v803_v61 = vpop.eup %802 }
  0xb9   :  { %v270_v62 = vmul.f32 %v803_v61, %v268_v58  ;;  %vm276_vm7 = vweird.f32 %v803_v61 }
  0xba   :  { %vm277_vm9 = vmor %vm275_vm8, %vm276_vm7 }
  0xbb   :  { %v271_v63 = vmul.f32 %v803_v61, %v270_v62 }
  0xbd   :  { %v272_v0 = vmul.f32 0.5, %v271_v63 }
  0xbf   :  { %v273_v2 = vsub.f32 1.5, %v272_v0 }
  0xc1   :  { %v274_v5 = vmul.f32 %v803_v61, %v273_v2 }
  0xc3   :  { %v278_v6 = vsel %vm277_vm9, %v803_v61, %v274_v5 }
  0xc4   :  { %v279_v7 = vmul.f32 %v278_v6, %v267_v3 }
  0xc6   :  { %v281_v11 = vmul.f32 %v279_v7, %v245_v48  ;;  %v284_v12 = vperm.slane %v279_v7, 0 }
  0xc8   :  { %v282_v13 = vsub.f32 %v280_v9, %v281_v11  ;;  %v289_v14 = vmul.f32 %v284_v12, %v230_v27  ;;  %v286_v16 = vmul.f32 %v284_v12, %v979_v1  ;;  %v287_v17 = vmul.f32 %v284_v12, %v981_v4 }
  0xc9   :  { %v288_v18 = vmul.f32 %v284_v12, %v985_v10 }
  0xca   :  { %v291_v15 = vperm.slane %v282_v13, 0 }
  0xcc   :  { %v296_v20 = vadd.f32 %v291_v15, %v289_v14  ;;  %v293_v22 = vadd.f32 %v291_v15, %v286_v16  ;;  %v294_v23 = vadd.f32 %v291_v15, %v287_v17  ;;  %v295_v24 = vadd.f32 %v291_v15, %v288_v18 }
  0xce   :  { %v300_v26 = vmax.f32 %v296_v20, 0.0  ;;  %v297_v28 = vmax.f32 %v293_v22, 0.0  ;;  %v298_v29 = vmax.f32 %v294_v23, 0.0  ;;  %v299_v30 = vmax.f32 %v295_v24, 0.0 }
  0xd0   :  { %v355_v31 = vpack.c.bf16 %v298_v29, %v297_v28  ;;  %v301_v32 = vrot.slane %v297_v28, 7  ;;  %v302_v33 = vrot.slane %v298_v29, 7  ;;  %v304_v35 = vrot.slane %v300_v26, 7 }
  0xd1   :  { %v321_v27 = vrot.slane %v297_v28, 1  ;;  %v322_v36 = vrot.slane %v298_v29, 1  ;;  %v323_v37 = vrot.slane %v299_v30, 1  ;;  %v303_v43 = vrot.slane %v299_v30, 7 }
  0xd2   :  { %719 = vmatmul.msk.bf16.vlgmr.msra.gmra.mxu0 %vm231_vm6, %v355_v31  ;;  %v307_v1 = vsel %vm115_vm0, %v301_v32, %v302_v33  ;;  %v308_v4 = vsel %vm115_vm0, %v304_v35, %v301_v32  ;;  %v324_v44 = vrot.slane %v300_v26, 1  ;;  %v356_v46 = vpack.c.bf16 %v300_v26, %v299_v30 }
  0xd3   :  { %v317_v10 = vsel %vm929_vm1, 0.0, %v308_v4  ;;  %v326_v38 = vsel %vm128_vm3, %v322_v36, %v323_v37  ;;  %v327_v39 = vsel %vm128_vm3, %v321_v27, %v322_v36  ;;  %v306_v19 = vsel %vm115_vm0, %v302_v33, %v303_v43 }
  0xd4   :  { %v353_v40 = vpack.c.bf16 %v307_v1, %v317_v10  ;;  %v338_v41 = vsel %vm944_vm4, 0.0, %v326_v38  ;;  %v328_v45 = vsel %vm128_vm3, %v324_v44, %v321_v27  ;;  %v305_v47 = vsel %vm115_vm0, %v303_v43, %v304_v35 }
  0xd5   :  { %v431_v42 = vpack.c.bf16 %v338_v41, %v327_v39  ;;  %v319_v25 = vsel %vm935_vm2, 0.0, %v306_v19  ;;  %v325_v48 = vsel %vm128_vm3, %v323_v37, %v324_v44  ;;  %v340_v49 = vsel %vm957_vm5, 0.0, %v328_v45 }
  0xd6   :  { %729 = vmatmul.msk.bf16.vlgmr.msra.gmra.mxu1 %vm231_vm6, %v353_v40  ;;  %v354_v50 = vpack.c.bf16 %v305_v47, %v319_v25  ;;  %v432_v51 = vpack.c.bf16 %v340_v49, %v325_v48  ;;  %v784_v49 = vld [vmem:[%s1142_s9 + $0x18] sm:$0xff] }
  0xd7   :  { %739 = vmatmul.msk.bf16.vlgmr.msra.gmra.mxu2 %vm231_vm6, %v431_v42  ;;  %631 = vmatpush.bf16.msra.mxu3 %v784_v49 }
  0xe2   :  { %720 = vmatmul.msk.bf16.gmra.mxu0 %vm231_vm6, %v356_v46 }
  0xe6   :  { %730 = vmatmul.msk.bf16.gmra.mxu1 %vm231_vm6, %v354_v50  ;;  %v783_v50 = vld [vmem:[%s1142_s9 + $0x10] sm:$0xff] }
  0xe7   :  { %740 = vmatmul.msk.bf16.gmra.mxu2 %vm231_vm6, %v432_v51  ;;  %632 = vmatpush.bf16.msra.mxu3 %v783_v50 }
 0x14f   :  { %v384_v52 = vpop.f32.mrf.mxu0 }
 0x153   :  { %v421_v53 = vpop.f32.mrf.mxu1 }
 0x154   :  { %v422_v8 = vadd.f32 %v421_v53, %v384_v52 }
 0x157   :  { %v386_v21 = vpop.f32.mrf.mxu0 }
 0x15a   :  { %v460_v54 = vpop.f32.mrf.mxu2 }
 0x15b   :  { %v423_v55 = vpop.f32.mrf.mxu1  ;;  %v470_v61 = vadd.f32 %v460_v54, %v422_v8  ;;  %v782_v54 = vld [vmem:[%s1142_s9 + $0x8] sm:$0xff] }
 0x15c   :  { %v424_v58 = vadd.f32 %v423_v55, %v386_v21  ;;  %633 = vmatpush.bf16.msra.mxu3 %v782_v54 }
 0x15d   :  { %v1064_v3 = vadd.f32 %v799_v34, %v470_v61  ;;  %v531_v61 = vld [vmem:[%s1141_s8] sm:$0x1] }
 0x15f   :  { %v389_v59 = vpop.f32.mrf.mxu0  ;;  %v497_v11 = vmul.f32 %v1064_v3, %v1064_v3  ;;  %v483_v16 = vsel %vm482_vm10, %v1064_v3, 0.0 }
 0x161   :  { %v501_v23 = vsel %vm482_vm10, %v497_v11, 0.0 }
 0x162   :  { %v462_v56 = vpop.f32.mrf.mxu2 }
 0x163   :  { %v426_v57 = vpop.f32.mrf.mxu1  ;;  %v471_v60 = vadd.f32 %v462_v56, %v424_v58  ;;  %v781_v56 = vld [vmem:[%s1142_s9] sm:$0xff] }
 0x164   :  { %v427_v62 = vadd.f32 %v426_v57, %v389_v59  ;;  %v518_v57 = vld [vmem:[%s1140_s7] sm:$0x1]  ;;  %v835_v59 = vmov 16.0   ;;  %634 = vmatpush.bf16.msra.mxu3 %v781_v56 }
 0x165   :  { %v1062_v0 = vadd.f32 %v799_v34, %v471_v60 }
 0x167   :  { %v498_v7 = vmul.f32 %v1062_v0, %v1062_v0  ;;  %v391_v9 = vpop.f32.mrf.mxu0  ;;  %v484_v12 = vsel %vm482_vm10, %v1062_v0, 0.0 }
 0x168   :  { %v485_v22 = vadd.f32 %v484_v12, %v483_v16 }
 0x169   :  { %v502_v17 = vsel %vm482_vm10, %v498_v7, 0.0 }
 0x16a   :  { %v465_v63 = vpop.f32.mrf.mxu2  ;;  %v503_v28 = vadd.f32 %v502_v17, %v501_v23 }
 0x16b   :  { %v472_v2 = vadd.f32 %v465_v63, %v427_v62  ;;  %v428_v6 = vpop.f32.mrf.mxu1 }
 0x16c   :  { %v429_v14 = vadd.f32 %v428_v6, %v391_v9  ;;  %v788_v6 = vld [vmem:[%s1144_s11 + $0x18] sm:$0xff] }
 0x16d   :  { %v1066_v5 = vadd.f32 %v799_v34, %v472_v2  ;;  %685 = vmatpush.bf16.msrb.mxu3 %v788_v6 }
 0x16f   :  { %v499_v13 = vmul.f32 %v1066_v5, %v1066_v5  ;;  %v486_v18 = vsel %vm482_vm10, %v1066_v5, 0.0 }
 0x170   :  { %v487_v29 = vadd.f32 %v486_v18, %v485_v22 }
 0x171   :  { %v504_v24 = vsel %vm482_vm10, %v499_v13, 0.0 }
 0x172   :  { %v467_v15 = vpop.f32.mrf.mxu2  ;;  %v505_v32 = vadd.f32 %v504_v24, %v503_v28 }
 0x173   :  { %v473_v20 = vadd.f32 %v467_v15, %v429_v14  ;;  %v787_v14 = vld [vmem:[%s1144_s11 + $0x10] sm:$0xff] }
 0x174   :  { %686 = vmatpush.bf16.msrb.mxu3 %v787_v14 }
 0x175   :  { %v481_v26 = vadd.f32 %v799_v34, %v473_v20 }
 0x177   :  { %v488_v30 = vsel %vm482_vm10, %v481_v26, 0.0  ;;  %v500_v31 = vmul.f32 %v481_v26, %v481_v26 }
 0x178   :  { %v489_v33 = vadd.f32 %v488_v30, %v487_v29 }
 0x179   :  { %v506_v35 = vsel %vm482_vm10, %v500_v31, 0.0 }
 0x17a   :  { %v490_v27 = vrot.slane %v489_v33, 4  ;;  %v507_v36 = vadd.f32 %v506_v35, %v505_v32 }
 0x17c   :  { %v491_v37 = vadd.f32 %v490_v27, %v489_v33  ;;  %v508_v1 = vrot.slane %v507_v36, 4 }
 0x17e   :  { %v492_v4 = vrot.slane %v491_v37, 2  ;;  %v509_v10 = vadd.f32 %v508_v1, %v507_v36 }
 0x180   :  { %v493_v38 = vadd.f32 %v492_v4, %v491_v37  ;;  %v510_v39 = vrot.slane %v509_v10, 2 }
 0x182   :  { %v494_v40 = vrot.slane %v493_v38, 1  ;;  %v511_v41 = vadd.f32 %v510_v39, %v509_v10 }
 0x184   :  { %v495_v42 = vadd.f32 %v494_v40, %v493_v38  ;;  %v512_v43 = vrot.slane %v511_v41, 1 }
 0x186   :  { %v496_v44 = vmul.f32 0.03125, %v495_v42  ;;  %v513_v19 = vadd.f32 %v512_v43, %v511_v41 }
 0x188   :  { %v514_v45 = vmul.f32 0.03125, %v513_v19  ;;  %v515_v46 = vmul.f32 %v496_v44, %v496_v44 }
 0x18a   :  { %v516_v47 = vsub.f32 %v514_v45, %v515_v46 }
 0x18c   :  { %v517_v25 = vmax.f32 %v516_v47, 0.0 }
 0x18e   :  { %v519_v48 = vadd.f32 1e-05, %v517_v25 }
 0x190   :  { %804 = vrsqrt.f32 %v519_v48  ;;  %vm526_vm12 = vweird.f32 %v519_v48 }
 0x191   :  { %806 = vrcp.f32 %v835_v59 }
 0x196   :  { %v805_v51 = vpop.eup %804 }
 0x197   :  { %v521_v52 = vmul.f32 %v805_v51, %v519_v48  ;;  %vm527_vm11 = vweird.f32 %v805_v51  ;;  %v807_v63 = vpop.eup %806 }
 0x198   :  { %vm528_vm13 = vmor %vm526_vm12, %vm527_vm11  ;;  %v571_v15 = vmul.f32 16.0, %v807_v63  ;;  %vm575_vm14 = vweird.f32 %v807_v63 }
 0x199   :  { %v522_v53 = vmul.f32 %v805_v51, %v521_v52  ;;  %v800_v52 = vld [vmem:[%s1143_s10] ss:$0 sm:$0xff] }
 0x19b   :  { %v523_v55 = vmul.f32 0.5, %v522_v53 }
 0x19d   :  { %v524_v21 = vsub.f32 1.5, %v523_v55 }
 0x19f   :  { %v525_v58 = vmul.f32 %v805_v51, %v524_v21 }
 0x1a1   :  { %v529_v8 = vsel %vm528_vm13, %v805_v51, %v525_v58  ;;  %v785_v51 = vld [vmem:[%s1144_s11] sm:$0xff] }
 0x1a2   :  { %v530_v60 = vmul.f32 %v529_v8, %v518_v57  ;;  %v801_v57 = vld [vmem:[%s1145_s12] ss:$0 sm:$0xff] }
 0x1a4   :  { %v532_v34 = vmul.f32 %v530_v60, %v496_v44  ;;  %v535_v62 = vperm.slane %v530_v60, 0 }
 0x1a6   :  { %v533_v2 = vsub.f32 %v531_v61, %v532_v34  ;;  %v537_v7 = vmul.f32 %v535_v62, %v1064_v3  ;;  %v538_v9 = vmul.f32 %v535_v62, %v1062_v0  ;;  %v539_v11 = vmul.f32 %v535_v62, %v1066_v5  ;;  %v786_v0 = vld [vmem:[%s1144_s11 + $0x8] sm:$0xff] }
 0x1a7   :  { %v540_v12 = vmul.f32 %v535_v62, %v481_v26  ;;  %v572_v5 = vsub.f32 1.0, %v571_v15  ;;  %687 = vmatpush.bf16.msrb.mxu3 %v786_v0 }
 0x1a8   :  { %v542_v13 = vperm.slane %v533_v2, 0 }
 0x1a9   :  { %v573_v27 = vmul.f32 %v807_v63, %v572_v5 }
 0x1aa   :  { %v546_v16 = vadd.f32 %v542_v13, %v539_v11  ;;  %v547_v17 = vadd.f32 %v542_v13, %v540_v12  ;;  %v544_v18 = vadd.f32 %v542_v13, %v537_v7  ;;  %v545_v20 = vadd.f32 %v542_v13, %v538_v9 }
 0x1ab   :  { %v574_v10 = vadd.f32 %v807_v63, %v573_v27  ;;  %688 = vmatpush.bf16.msrb.mxu3 %v785_v51 }
 0x1ac   :  { %v550_v22 = vmax.f32 %v546_v16, 0.0  ;;  %v551_v23 = vmax.f32 %v547_v17, 0.0  ;;  %v548_v24 = vmax.f32 %v544_v18, 0.0  ;;  %v549_v3 = vmax.f32 %v545_v20, 0.0 }
 0x1ad   :  { %v576_v42 = vsel %vm575_vm14, %v807_v63, %v574_v10 }
 0x1ae   :  { %v561_v26 = vsel %vm482_vm10, %v550_v22, 0.0  ;;  %v562_v28 = vsel %vm482_vm10, %v551_v23, 0.0  ;;  %v552_v29 = vsel %vm482_vm10, %v548_v24, 0.0  ;;  %v553_v30 = vsel %vm482_vm10, %v549_v3, 0.0 }
 0x1af   :  { %v563_v31 = vadd.f32 %v562_v28, %v561_v26  ;;  %v554_v32 = vadd.f32 %v553_v30, %v552_v29 }
 0x1b1   :  { %v564_v33 = vrot.slane %v563_v31, 4  ;;  %v555_v35 = vrot.slane %v554_v32, 4 }
 0x1b3   :  { %v565_v36 = vadd.f32 %v564_v33, %v563_v31  ;;  %v556_v37 = vadd.f32 %v555_v35, %v554_v32 }
 0x1b5   :  { %v557_v1 = vrot.slane %v556_v37, 2  ;;  %v566_v4 = vrot.slane %v565_v36, 2 }
 0x1b7   :  { %v558_v38 = vadd.f32 %v557_v1, %v556_v37  ;;  %v567_v39 = vadd.f32 %v566_v4, %v565_v36 }
 0x1b9   :  { %v559_v40 = vrot.slane %v558_v38, 1  ;;  %v568_v41 = vrot.slane %v567_v39, 1 }
 0x1bb   :  { %v560_v43 = vadd.f32 %v559_v40, %v558_v38  ;;  %v569_v44 = vadd.f32 %v568_v41, %v567_v39 }
 0x1bd   :  { %v577_v19 = vmul.f32 %v576_v42, %v560_v43  ;;  %v578_v45 = vmul.f32 %v576_v42, %v569_v44 }
 0x1bf   :  { %v579_v46 = vpack.c.bf16 %v577_v19, %v577_v19  ;;  %v580_v47 = vpack.c.bf16 %v578_v45, %v578_v45 }
 0x1c1   :  { %v595_v25 = vunpack.c.l.b16 %v579_v46  ;;  %v596_v48 = vunpack.c.l.b16 %v580_v47 }
 0x1c3   :  { %v598_v49 = vsel %vm597_vm15, %v596_v48, %v595_v25 }
 0x1c4   :  { %v599_v50 = vpack.c.b16 %v598_v49, %v598_v49 }
 0x1c6   :  { %757 = vmatmul.msk.bf16.vlgmr.msra.gmra.mxu3 %vm482_vm10, %v599_v50 }
 0x249   :  { %v636_v53 = vpop.f32.mrf.mxu3 }
 0x24a   :  { %v637_v54 = vadd.f32 %v800_v52, %v636_v53 }
 0x24c   :  { %v640_v55 = vmax.f32 %v637_v54, 0.0 }
 0x24e   :  { %v641_v21 = vpack.c.bf16 %v640_v55, %v640_v55 }
 0x250   :  { %774 = vmatmul.msk.bf16.vlgmr.msrb.gmra.mxu3 %vm482_vm10, %v641_v21 }
 0x251   :  { %v638_v56 = vpop.f32.mrf.mxu3 }
 0x2d3   :  { %v690_v58 = vpop.f32.mrf.mxu3 }
 0x2d4   :  { %v691_v59 = vadd.f32 %v801_v57, %v690_v58 }
 0x2d6   :  { %694 = vst [vmem:[#allocation2] sm:$0x3] %v691_v59 }
 0x2d7   :  { %705 = dma.vmem_to_hbm [thread:$0]  %s701_s3, 32, %s703_s6, [#allocation3]  }
 0x2db   :  { %v692_v8 = vpop.f32.mrf.mxu3 }
 0x2dc   :  { %832 = dma.done.wait [#allocation3], 32  }
 0x2dd   :  { %833 = vsyncadd [#allocation3], 4294967264 }
 0x2de   :  { %710 = vsyncpa [#allocation3], 1 }

</bundles_post_ra>
